<compile_context>
chip_gen: v6e
topology: v6e:2x2x1
jax: 0.10.0
libtpu: 0.0.40
codegen_flags: <defaults>
</compile_context>

<pallas_src>
import functools

import jax
import jax.numpy as jnp
from jax import lax
from jax.experimental import pallas as pl
from jax.experimental.pallas import tpu as pltpu

_LANE = 128


def _round_up(n: int, m: int) -> int:
    return ((n + m - 1) // m) * m


def _block_budget() -> tuple[int, int]:
    """(target block bytes, vmem_limit_bytes) tuned per TPU generation."""
    kind = ""
    try:
        kind = jax.devices()[0].device_kind.lower()
    except Exception:
        pass
    if "v5" in kind:
        # v5e: ~0.8 TB/s HBM -> 3 MiB blocks already amortize step overhead.
        return 3 << 20, 32 << 20
    if "v6" in kind:
        # v6e: ~1.4 TB/s HBM.
        return 4 << 20, 32 << 20
    # v7x (3.2 TB/s HBM, 64 MiB physical VMEM) and unknown/future chips:
    # bigger blocks, explicit limit above the 32 MiB scoped default.
    return 6 << 20, 40 << 20


def _copy_kernel(x_ref, o_ref):
    # Pure block copy; the trim is expressed by the output array being only
    # t_out wide (the partial trailing tile is masked at writeback by Pallas).
    o_ref[...] = x_ref[...]


def _trim_copy_kernel(x_ref, o_ref, *, t_out):
    # Full-width row block: static prefix slice of the (r_tile, T) input;
    # output block is exactly t_out wide (full output dim -> lane-dense, no
    # round-up masking on stores).
    o_ref[...] = x_ref[:, :t_out]


def _same_pad_pallas(x2d: jax.Array, t_out: int, block_target_bytes=None) -> jax.Array:
    rows, T = x2d.shape
    itemsize = jnp.dtype(x2d.dtype).itemsize
    # Sublane packing multiple: 8 for f32, 16 for bf16/f16, 32 for int8/fp8.
    sub = 8 * max(1, 4 // itemsize)

    target, vmem_limit = _block_budget()
    if block_target_bytes is not None:
        target = int(block_target_bytes)

    r_full = _round_up(rows, sub)
    t_cap = _round_up(t_out, _LANE)

    if sub * T * itemsize <= target:
        # ---- Full-width path: one row-block spans the whole time axis. ----
        r_tile = min(r_full, max(sub, (target // (T * itemsize)) // sub * sub))
        if rows >= 2 * sub:
            # Keep >= 2 grid steps (v7x megacore + double-buffered pipeline).
            r_tile = min(r_tile, _round_up(pl.cdiv(rows, 2), sub))
        grid = (pl.cdiv(rows, r_tile),)
        kernel = functools.partial(_trim_copy_kernel, t_out=t_out)
        in_specs = [pl.BlockSpec((r_tile, T), lambda i: (i, 0))]
        out_specs = pl.BlockSpec((r_tile, t_out), lambda i: (i, 0))
        semantics = ("parallel",)
    else:
        # ---- Tiled-time path: T too long for a single full-width block. ----
        t_tile = min(t_cap, 2048)
        r_tile = min(r_full, max(sub, (target // (t_tile * itemsize)) // sub * sub))
        if r_tile * t_tile * itemsize < target and t_tile < t_cap:
            # Few rows, long time axis: grow the time tile (past the 2048 cap)
            # so blocks still reach the byte target.
            t_tile = min(
                t_cap,
                max(t_tile, _round_up(target // (r_tile * itemsize), _LANE)),
            )
        grid = (pl.cdiv(rows, r_tile), pl.cdiv(t_out, t_tile))
        kernel = _copy_kernel
        in_specs = [pl.BlockSpec((r_tile, t_tile), lambda i, j: (i, j))]
        out_specs = pl.BlockSpec((r_tile, t_tile), lambda i, j: (i, j))
        semantics = ("parallel", "parallel")

    return pl.pallas_call(
        kernel,
        out_shape=jax.ShapeDtypeStruct((rows, t_out), x2d.dtype),
        grid_spec=pltpu.PrefetchScalarGridSpec(
            num_scalar_prefetch=0,
            grid=grid,
            in_specs=in_specs,
            out_specs=out_specs,
        ),
        compiler_params=pltpu.CompilerParams(
            dimension_semantics=semantics,
            vmem_limit_bytes=vmem_limit,
        ),
        cost_estimate=pl.CostEstimate(
            flops=0,
            transcendentals=0,
            bytes_accessed=int(rows) * (int(T) + int(t_out)) * int(itemsize),
        ),
    )(x2d)


def same_pad(
    x: jax.Array,
    kernel_size: int,
    causal: bool = False,
    *,
    min_pallas_bytes: int = 4 << 20,
    block_target_bytes: int | None = None,
) -> jax.Array:
    """Pallas implementation of SamePad.forward for x of shape (B, C, T)."""
    if causal:
        remove = kernel_size - 1
    else:
        remove = 1 if kernel_size % 2 == 0 else 0

    if remove <= 0:
        return x  # identity

    B, C, T = x.shape
    t_out = T - remove
    if t_out <= 0:
        raise ValueError(f"remove={remove} >= time dim {T}")

    # Default path: a plain XLA slice fuses into the consumer and avoids a
    # full HBM round-trip — the dominant win for a pure-data-movement op.
    out_bytes = B * C * t_out * jnp.dtype(x.dtype).itemsize
    if out_bytes < min_pallas_bytes:
        return lax.slice(x, (0, 0, 0), (B, C, t_out))

    x2d = x.reshape(B * C, T)  # contiguous reshape: free
    y2d = _same_pad_pallas(x2d, t_out, block_target_bytes)
    return y2d.reshape(B, C, t_out)


if __name__ == "__main__":
    key = jax.random.PRNGKey(0)
    B, C, T = 2, 4, 16
    x = jax.random.normal(key, (B, C, T), dtype=jnp.float32)

    # Case 1: non-causal, even kernel_size -> remove 1 (forced Pallas path,
    # full-width block, single-step grid).
    y_even = jax.block_until_ready(
        same_pad(x, kernel_size=4, causal=False, min_pallas_bytes=0))
    assert y_even.shape == (B, C, T - 1)
    assert jnp.array_equal(y_even, x[:, :, :-1])

    # Case 2: causal, kernel_size=3 -> remove 2 (forced Pallas path).
    y_causal = jax.block_until_ready(
        same_pad(x, kernel_size=3, causal=True, min_pallas_bytes=0))
    assert y_causal.shape == (B, C, T - 2)
    assert jnp.array_equal(y_causal, x[:, :, :-2])

    # Case 3: non-causal, odd kernel_size -> identity (no kernel launch).
    y_odd = jax.block_until_ready(same_pad(x, kernel_size=3, causal=False))
    assert y_odd.shape == (B, C, T)
    assert jnp.array_equal(y_odd, x)

    # Case 4: ragged rows (B*C not a multiple of 8) -> partial row block,
    # masked writeback (forced Pallas path).
    x2 = jax.random.normal(jax.random.PRNGKey(0), (2, 5, 20), dtype=jnp.float32)
    y2 = jax.block_until_ready(
        same_pad(x2, kernel_size=6, causal=False, min_pallas_bytes=0))
    assert y2.shape == (2, 5, 19)
    assert jnp.array_equal(y2, x2[:, :, :-1])

    # Case 5: tiled-time path with a 2x2 grid (tiny block target forces the
    # long-T code path at small shapes; partial trailing time tile masked).
    x3 = jax.random.normal(jax.random.PRNGKey(1), (2, 8, 2304), dtype=jnp.float32)
    y3 = jax.block_until_ready(
        same_pad(x3, kernel_size=4, causal=False,
                 min_pallas_bytes=0, block_target_bytes=64 * 1024))
    assert y3.shape == (2, 8, 2303)
    assert jnp.array_equal(y3, x3[:, :, :-1])

    # Case 6: full-width path with the row tile split for >= 2 grid steps.
    x4 = jax.random.normal(jax.random.PRNGKey(2), (4, 8, 64), dtype=jnp.float32)
    y4 = jax.block_until_ready(
        same_pad(x4, kernel_size=4, causal=False, min_pallas_bytes=0))
    assert y4.shape == (4, 8, 63)
    assert jnp.array_equal(y4, x4[:, :, :-1])

    # Case 7: default wrapper behaviour (small tensor -> fusable XLA slice).
    y_fast = jax.block_until_ready(same_pad(x, kernel_size=4, causal=False))
    assert jnp.array_equal(y_fast, x[:, :, :-1])

    print("KERNEL_OK")
</pallas_src>

<mosaic_0001>
module attributes {stable_mosaic.version = 11 : i64} {
  func.func @_trim_copy_kernel(%arg0: i32, %arg1: memref<8x16xf32, #tpu.memory_space<vmem>>, %arg2: memref<8x15xf32, #tpu.memory_space<vmem>>) attributes {dimension_semantics = [#tpu.dimension_semantics<parallel>], iteration_bounds = array<i64: 1>, scalar_prefetch = 0 : i64, scratch_operands = 0 : i64, tpu.core_type = #tpu.core_type<tc>, window_params = [{transform_indices = @transform_0, window_bounds = array<i64: 8, 16>}, {transform_indices = @transform_1, window_bounds = array<i64: 8, 15>}]} {
    %c0 = arith.constant 0 : index
    %c0_0 = arith.constant 0 : index
    %0 = vector.load %arg1[%c0, %c0_0] : memref<8x16xf32, #tpu.memory_space<vmem>>, vector<8x15xf32>
    %c0_1 = arith.constant 0 : index
    %c0_2 = arith.constant 0 : index
    %1 = vector.load %arg2[%c0_1, %c0_2] : memref<8x15xf32, #tpu.memory_space<vmem>>, vector<8x15xf32>
    tpu.vector_store %arg2[%c0_1, %c0_2], %0 {strides = array<i32>} : memref<8x15xf32, #tpu.memory_space<vmem>>, vector<8x15xf32>,
    return
  }
  func.func @transform_0(%arg0: i32) -> (i32, i32) {
    %c0_i32 = arith.constant 0 : i32
    %c0_i32_0 = arith.constant 0 : i32
    return %arg0, %c0_i32 : i32, i32
  }
  func.func @transform_1(%arg0: i32) -> (i32, i32) {
    %c0_i32 = arith.constant 0 : i32
    %c0_i32_0 = arith.constant 0 : i32
    return %arg0, %c0_i32 : i32, i32
  }
}

</mosaic_0001>

<bundles_post_ra>
// kernel: tpu_custom_call.1
= control target key start
LH: loop header
LB: loop body
LE: loop exit
PB: predicated region body
PF: predicated region fallthrough
CT: control target
= control target key end

     0   :  { %6 = vsyncpa [#allocation3], 0  ;;  %s103_s0 = inlined_call_operand.hbm [shape: f32[8,16], index: 0, kind: input, shape index: {}]   ;;  %s104_s1 = inlined_call_operand.hbm [shape: f32[8,15], index: 1, kind: output, shape index: {}]  }
   0x1   :  { %7 = vsyncpa [#allocation4], 0  ;;  %s85_s6 = smov [#allocation2]  }
   0x2   :  { %s14_s7 = sshll.u32 %s85_s6, 4  ;;  %s15_s7 = int_to_ptr.vmem [resolvable:$true] %s14_s7 }
   0x3   :  { %s49_s8 = scalar_lea.vmem %s15_s7, 128  ;;  %p54_p1 = scmp.lt.s32.totalorder %s15_s7, %s15_s7 }
   0x4   :  { %p50_p0 = scmp.ne.s32.totalorder %s15_s7, %s49_s8  ;;  %p55_p2 = scmp.lt.s32.totalorder %s49_s8, %s49_s8 }
   0x6   :  { %p56_p3 = por %p55_p2, %p54_p1 }
   0x8   :  { %p57_p4 = pnand %p56_p3, %p50_p0 }
   0xa   :  { %60 = shalt.err (!%p57_p4)
}
   0xb   :  { %17 = dma.hbm_to_vmem [thread:$0]  %s103_s0, 128, %s15_s7, [#allocation3]  }
   0xc   :  { %81 = dma.done.wait [#allocation3], 128  }
   0xd   :  { %82 = vsyncadd [#allocation3], 4294967168  ;;  %s86_s11 = smov [#allocation5]   ;;  %vm22_vm0 = vcmask 121856   ;;  %v21_v0 = vld [vmem:[#allocation2] sm:$0xff] }
   0xe   :  { %s30_s12 = sshll.u32 %s86_s11, 4  ;;  %23 = vst.msk [vmem:[#allocation5] sm:$0xff] %vm22_vm0, %v21_v0  ;;  %s31_s12 = int_to_ptr.vmem [resolvable:$true] %s30_s12 }
   0xf   :  { %s61_s13 = scalar_lea.vmem %s31_s12, 128  ;;  %p66_p6 = scmp.lt.s32.totalorder %s31_s12, %s31_s12 }
  0x10   :  { %p62_p5 = scmp.ne.s32.totalorder %s31_s12, %s61_s13  ;;  %p67_p7 = scmp.lt.s32.totalorder %s61_s13, %s61_s13 }
  0x12   :  { %p68_p8 = por %p67_p7, %p66_p6 }
  0x14   :  { %p69_p9 = pnand %p68_p8, %p62_p5 }
  0x16   :  { %72 = shalt.err (!%p69_p9)
}
  0x17   :  { %33 = dma.vmem_to_hbm [thread:$0]  %s31_s12, 128, %s104_s1, [#allocation4]  }
  0x18   :  { %83 = dma.done.wait [#allocation4], 128  }
  0x19   :  { %84 = vsyncadd [#allocation4], 4294967168 }
  0x1a   :  { %37 = vsyncpa [#allocation3], 1 }
  0x1b   :  { %38 = vsyncpa [#allocation4], 1 }

</bundles_post_ra>
